<compile_context>
chip_gen: v6e
topology: v6e:2x2x1
jax: 0.10.0
libtpu: 0.0.40
codegen_flags: <defaults>
</compile_context>

<pallas_src>
import math
from functools import partial

import numpy as np
import jax
import jax.numpy as jnp
from jax.experimental import pallas as pl
from jax.experimental.pallas import tpu as pltpu


# ----------------------------------------------------------------------------
# Setup glue: real spherical harmonics sampled on a sphere grid.
# ----------------------------------------------------------------------------
def _assoc_legendre(lmax, x):
    """Associated Legendre P_l^m(x) for 0 <= m <= l <= lmax (no C-S phase)."""
    P = {}
    s = np.sqrt(np.clip(1.0 - x * x, 0.0, None))
    P[(0, 0)] = np.ones_like(x)
    for m in range(1, lmax + 1):
        P[(m, m)] = P[(m - 1, m - 1)] * (2 * m - 1) * s
    for m in range(0, lmax):
        P[(m + 1, m)] = x * (2 * m + 1) * P[(m, m)]
    for m in range(0, lmax + 1):
        for l in range(m + 2, lmax + 1):
            P[(l, m)] = ((2 * l - 1) * x * P[(l - 1, m)]
                         - (l + m - 1) * P[(l - 2, m)]) / (l - m)
    return P


def _real_sh_grid(lmax, betas, alphas):
    """Orthonormal real SH Y[(l,m) flat, beta, alpha] on the given grid."""
    ct = np.cos(betas)
    P = _assoc_legendre(lmax, ct)
    B, A = betas.shape[0], alphas.shape[0]
    out = np.zeros(((lmax + 1) ** 2, B, A), dtype=np.float64)
    i = 0
    for l in range(lmax + 1):
        for m in range(-l, l + 1):
            am = abs(m)
            norm = math.sqrt((2 * l + 1) / (4 * math.pi)
                             * math.factorial(l - am) / math.factorial(l + am))
            plm = P[(l, am)]
            if m == 0:
                ang = np.ones_like(alphas)
                f = norm
            elif m > 0:
                ang = np.cos(m * alphas)
                f = math.sqrt(2.0) * norm
            else:
                ang = np.sin(am * alphas)
                f = math.sqrt(2.0) * norm
            out[i] = f * plm[:, None] * ang[None, :]
            i += 1
    return out


def make_s2_matrices(lmax, res, lmax_out=None, normalization="component"):
    """Build ToSOFT / FromSOFT matrices.

    Returns
      to_mat   [(lmax+1)^2,      res*res]  : coeffs -> grid signal
      from_mat [res*res, (lmax_out+1)^2]   : grid signal -> coeffs
    """
    if lmax_out is None:
        lmax_out = lmax
    assert normalization == "component"
    # beta nodes: Gauss-Legendre in cos(beta) -> exact quadrature for the
    # band-limited round trip; alpha nodes: uniform.
    # TODO(synk): e3nn's exact SOFT equiangular-beta quadrature weights are not
    # reproduced bit-for-bit; this uses an equivalent exact quadrature.
    ct, w_beta = np.polynomial.legendre.leggauss(res)
    betas = np.arccos(ct)
    alphas = 2.0 * np.pi * np.arange(res) / res
    w_alpha = 2.0 * np.pi / res

    Y = _real_sh_grid(max(lmax, lmax_out), betas, alphas)     # [D_max, B, A]
    Y_comp = math.sqrt(4.0 * math.pi) * Y                     # 'component' norm

    d_in = (lmax + 1) ** 2
    d_out = (lmax_out + 1) ** 2
    G = res * res

    to_mat = Y_comp[:d_in].reshape(d_in, G)                   # [D_in, G]
    # FromSOFT: c_j = (1/4pi) sum_{b,a} s(b,a) Y_comp_j(b,a) w_b w_alpha
    qw = (w_beta[:, None] * w_alpha / (4.0 * math.pi))         # [B, 1]
    from_mat = (Y_comp[:d_out] * qw[None, :, :]).reshape(d_out, G).T  # [G, D_out]

    return (jnp.asarray(to_mat, dtype=jnp.float32),
            jnp.asarray(from_mat, dtype=jnp.float32))


# ----------------------------------------------------------------------------
# Pallas kernel: acc += act(x @ to_chunk) @ from_chunk, over G chunks.
# ----------------------------------------------------------------------------
def _s2act_kernel(x_ref, to_ref, from_ref, o_ref, acc_ref, *, act):
    k = pl.program_id(1)                                   # G-chunk index

    @pl.when(k == 0)
    def _init():
        acc_ref[...] = jnp.zeros_like(acc_ref)

    # [tm, tg] grid-signal chunk, f32 accumulation on the MXU.
    sig = jnp.dot(x_ref[...], to_ref[...],
                  preferred_element_type=jnp.float32)
    # Pointwise activation stays in f32 (v5e has no bf16 VPU/EUP).
    sig = act(sig)
    # Back-projection chunk, accumulated in f32 scratch.
    acc_ref[...] += jnp.dot(sig.astype(from_ref.dtype), from_ref[...],
                            preferred_element_type=jnp.float32)

    @pl.when(k == pl.num_programs(1) - 1)
    def _finalize():
        o_ref[...] = acc_ref[...].astype(o_ref.dtype)


def _round_up(x, m):
    return ((x + m - 1) // m) * m


def s2_activation(features, to_mat, from_mat, *, act=jnp.tanh,
                  tm=128, tg=512, compute_dtype=jnp.bfloat16):
    """features [..., D_in] -> [..., D_out].

    tm: row tile (MXU M dimension). tg: sphere-grid (lane) tile of the
    intermediate signal. compute_dtype: MXU operand dtype (accumulation and
    activation are always f32).
    """
    batch_shape = features.shape[:-1]
    d_in = features.shape[-1]
    g = to_mat.shape[1]
    d_out = from_mat.shape[1]
    assert to_mat.shape[0] == d_in and from_mat.shape[0] == g

    x = features.reshape(-1, d_in)
    n = x.shape[0]

    # Row tile: large enough to fill the MXU, clamped for tiny batches; rows
    # are zero-padded so callers face no divisibility constraint.
    tm = max(8, min(tm, _round_up(n, 8)))
    n_pad = _round_up(n, tm)

    # Sphere-grid tile: multiple of 128 lanes; pad G with zero columns of
    # to_mat and zero rows of from_mat (zero rows => padded grid points
    # contribute nothing regardless of act(0)).
    tg = max(128, min(tg, _round_up(g, 128)))
    g_pad = _round_up(g, tg)

    # Lane-dense output: pad D_out to a multiple of 128 (unmasked stores);
    # the extra MXU columns are free (MXU pads N anyway). Sliced off below.
    d_out_pad = _round_up(d_out, 128)

    cd = compute_dtype
    x_p = jnp.zeros((n_pad, d_in), cd).at[:n].set(x.astype(cd))
    to_p = jnp.zeros((d_in, g_pad), cd).at[:, :g].set(to_mat.astype(cd))
    from_p = jnp.zeros((g_pad, d_out_pad), cd).at[:g, :d_out].set(
        from_mat.astype(cd))

    # Note: x's block index is constant along the G axis, so it is only
    # DMA'd when the row tile changes; to/from chunks stream (and benefit
    # from the default double-buffering).
    out = pl.pallas_call(
        partial(_s2act_kernel, act=act),
        out_shape=jax.ShapeDtypeStruct((n_pad, d_out_pad), features.dtype),
        grid_spec=pltpu.PrefetchScalarGridSpec(
            num_scalar_prefetch=0,
            grid=(n_pad // tm, g_pad // tg),
            in_specs=[
                pl.BlockSpec((tm, d_in), lambda i, k: (i, 0)),
                pl.BlockSpec((d_in, tg), lambda i, k: (0, k)),
                pl.BlockSpec((tg, d_out_pad), lambda i, k: (k, 0)),
            ],
            out_specs=pl.BlockSpec((tm, d_out_pad), lambda i, k: (i, 0)),
            scratch_shapes=[pltpu.VMEM((tm, d_out_pad), jnp.float32)],
        ),
        compiler_params=pltpu.CompilerParams(
            dimension_semantics=("parallel", "arbitrary"),
            vmem_limit_bytes=48 * 1024 * 1024,
        ),
    )(x_p, to_p, from_p)

    return out[:n, :d_out].reshape(*batch_shape, d_out)


def s2_activation_ref(features, to_mat, from_mat, act=jnp.tanh):
    """Pure-JAX f32 reference (ToSOFT -> act -> FromSOFT)."""
    sig = jnp.einsum("...i,ig->...g", features, to_mat)
    sig = act(sig)
    return jnp.einsum("...g,go->...o", sig, from_mat)


# ----------------------------------------------------------------------------
if __name__ == "__main__":
    # TODO(synk): parity bookkeeping of Rs/Rs_out (even/odd act detection) and
    # random_rot grid rotation are not reproduced; activation is a plain
    # pointwise callable (default tanh), as in the module's forward pass.
    lmax = 3           # Rs = [(1, l, +1) for l in 0..3]  ->  D_in = 16
    res = 16           # SOFT grid resolution -> 16 x 16 = 256 sphere samples
    lmax_out = 3       # default: same as lmax            ->  D_out = 16

    to_mat, from_mat = make_s2_matrices(lmax, res, lmax_out)

    key = jax.random.PRNGKey(0)
    # features: [..., (lmax+1)^2] ; small batch (2, 8)
    x = jax.random.normal(key, (2, 8, (lmax + 1) ** 2), dtype=jnp.float32)

    y = s2_activation(x, to_mat, from_mat, act=jnp.tanh)
    jax.block_until_ready(y)

    assert y.shape == (2, 8, (lmax_out + 1) ** 2)
    assert y.dtype == jnp.float32

    # Loose tolerance: MXU operands are bf16 (f32 accumulation / f32 tanh).
    y_ref = s2_activation_ref(x, to_mat, from_mat, act=jnp.tanh)
    np.testing.assert_allclose(np.asarray(y), np.asarray(y_ref),
                               rtol=1e-1, atol=1e-1)

    print("KERNEL_OK")
</pallas_src>

<mosaic_0001>
module attributes {stable_mosaic.version = 11 : i64} {
  func.func @_s2act_kernel(%arg0: i32, %arg1: i32, %arg2: memref<16x16xbf16, #tpu.memory_space<vmem>>, %arg3: memref<16x256xbf16, #tpu.memory_space<vmem>>, %arg4: memref<256x128xbf16, #tpu.memory_space<vmem>>, %arg5: memref<16x128xf32, #tpu.memory_space<vmem>>, %arg6: memref<16x128xf32, #tpu.memory_space<vmem>>) attributes {dimension_semantics = [#tpu.dimension_semantics<parallel>, #tpu.dimension_semantics<arbitrary>], iteration_bounds = array<i64: 1, 1>, scalar_prefetch = 0 : i64, scratch_operands = 1 : i64, tpu.core_type = #tpu.core_type<tc>, window_params = [{transform_indices = @transform_0, window_bounds = array<i64: 16, 16>}, {transform_indices = @transform_1, window_bounds = array<i64: 16, 256>}, {transform_indices = @transform_2, window_bounds = array<i64: 256, 128>}, {transform_indices = @transform_3, window_bounds = array<i64: 16, 128>}]} {
    %c0_i32 = arith.constant 0 : i32
    %0 = arith.cmpi eq, %arg1, %c0_i32 : i32
    %1 = arith.extui %0 : i1 to i32
    %c0_i32_0 = arith.constant 0 : i32
    %2 = arith.cmpi ne, %1, %c0_i32_0 : i32
    scf.if %2 {
      %cst_13 = arith.constant 0.000000e+00 : f32
      %16 = vector.broadcast %cst_13 : f32 to vector<16x128xf32>
      %c0_14 = arith.constant 0 : index
      %c0_15 = arith.constant 0 : index
      %17 = vector.load %arg6[%c0_14, %c0_15] : memref<16x128xf32, #tpu.memory_space<vmem>>, vector<16x128xf32>
      tpu.vector_store %arg6[%c0_14, %c0_15], %16 {strides = array<i32>} : memref<16x128xf32, #tpu.memory_space<vmem>>, vector<16x128xf32>,
    } else {
    }
    %c0 = arith.constant 0 : index
    %c0_1 = arith.constant 0 : index
    %3 = vector.load %arg2[%c0, %c0_1] : memref<16x16xbf16, #tpu.memory_space<vmem>>, vector<16x16xbf16>
    %c0_2 = arith.constant 0 : index
    %c0_3 = arith.constant 0 : index
    %4 = vector.load %arg3[%c0_2, %c0_3] : memref<16x256xbf16, #tpu.memory_space<vmem>>, vector<16x256xbf16>
    %cst = arith.constant dense<0.000000e+00> : vector<16x256xf32>
    %5 = tpu.matmul %3, %4, %cst {dimension_numbers = #tpu.dot_dimension_numbers<[1], [0], [0], [1], [0, 0, 1, 1], [], []>} : vector<16x16xbf16>, vector<16x256xbf16>, vector<16x256xf32> -> vector<16x256xf32>
    %6 = math.tanh %5 : vector<16x256xf32>
    %c0_4 = arith.constant 0 : index
    %c0_5 = arith.constant 0 : index
    %7 = vector.load %arg6[%c0_4, %c0_5] : memref<16x128xf32, #tpu.memory_space<vmem>>, vector<16x128xf32>
    %8 = arith.truncf %6 : vector<16x256xf32> to vector<16x256xbf16>
    %c0_6 = arith.constant 0 : index
    %c0_7 = arith.constant 0 : index
    %9 = vector.load %arg4[%c0_6, %c0_7] : memref<256x128xbf16, #tpu.memory_space<vmem>>, vector<256x128xbf16>
    %cst_8 = arith.constant dense<0.000000e+00> : vector<16x128xf32>
    %10 = tpu.matmul %8, %9, %cst_8 {dimension_numbers = #tpu.dot_dimension_numbers<[1], [0], [0], [1], [0, 0, 1, 1], [], []>} : vector<16x256xbf16>, vector<256x128xbf16>, vector<16x128xf32> -> vector<16x128xf32>
    %11 = arith.addf %7, %10 : vector<16x128xf32>
    %c0_9 = arith.constant 0 : index
    %c0_10 = arith.constant 0 : index
    %12 = vector.load %arg6[%c0_9, %c0_10] : memref<16x128xf32, #tpu.memory_space<vmem>>, vector<16x128xf32>
    tpu.vector_store %arg6[%c0_9, %c0_10], %11 {strides = array<i32>} : memref<16x128xf32, #tpu.memory_space<vmem>>, vector<16x128xf32>,
    %c0_i32_11 = arith.constant 0 : i32
    %13 = arith.cmpi eq, %arg1, %c0_i32_11 : i32
    %14 = arith.extui %13 : i1 to i32
    %c0_i32_12 = arith.constant 0 : i32
    %15 = arith.cmpi ne, %14, %c0_i32_12 : i32
    scf.if %15 {
      %c0_13 = arith.constant 0 : index
      %c0_14 = arith.constant 0 : index
      %16 = vector.load %arg6[%c0_13, %c0_14] : memref<16x128xf32, #tpu.memory_space<vmem>>, vector<16x128xf32>
      %c0_15 = arith.constant 0 : index
      %c0_16 = arith.constant 0 : index
      %17 = vector.load %arg5[%c0_15, %c0_16] : memref<16x128xf32, #tpu.memory_space<vmem>>, vector<16x128xf32>
      tpu.vector_store %arg5[%c0_15, %c0_16], %16 {strides = array<i32>} : memref<16x128xf32, #tpu.memory_space<vmem>>, vector<16x128xf32>,
    } else {
    }
    return
  }
  func.func @transform_0(%arg0: i32, %arg1: i32) -> (i32, i32) {
    %c0_i32 = arith.constant 0 : i32
    %c0_i32_0 = arith.constant 0 : i32
    return %arg0, %c0_i32 : i32, i32
  }
  func.func @transform_1(%arg0: i32, %arg1: i32) -> (i32, i32) {
    %c0_i32 = arith.constant 0 : i32
    %c0_i32_0 = arith.constant 0 : i32
    return %c0_i32, %arg1 : i32, i32
  }
  func.func @transform_2(%arg0: i32, %arg1: i32) -> (i32, i32) {
    %c0_i32 = arith.constant 0 : i32
    %c0_i32_0 = arith.constant 0 : i32
    return %arg1, %c0_i32 : i32, i32
  }
  func.func @transform_3(%arg0: i32, %arg1: i32) -> (i32, i32) {
    %c0_i32 = arith.constant 0 : i32
    %c0_i32_0 = arith.constant 0 : i32
    return %arg0, %c0_i32 : i32, i32
  }
}

</mosaic_0001>

<bundles_post_ra>
// kernel: tpu_custom_call.1
= control target key start
LH: loop header
LB: loop body
LE: loop exit
PB: predicated region body
PF: predicated region fallthrough
CT: control target
= control target key end

     0   :  { %8 = vsyncpa [#allocation4], 0  ;;  %s547_s0 = inlined_call_operand.hbm [shape: bf16[16,16], index: 0, kind: input, shape index: {}]   ;;  %s548_s1 = inlined_call_operand.hbm [shape: bf16[16,256], index: 1, kind: input, shape index: {}]   ;;  %s549_s2 = inlined_call_operand.hbm [shape: bf16[256,128], index: 2, kind: input, shape index: {}]   ;;  %s550_s3 = inlined_call_operand.hbm [shape: f32[16,128], index: 3, kind: output, shape index: {}]  }
   0x1   :  { %9 = vsyncpa [#allocation7], 0 }
   0x2   :  { %10 = vsyncpa [#allocation5], 0  ;;  %s500_s12 = smov [#allocation6]  }
   0x3   :  { %s28_s13 = sshll.u32 %s500_s12, 4  ;;  %s29_s13 = int_to_ptr.vmem [resolvable:$true] %s28_s13 }
   0x4   :  { %s422_s14 = scalar_lea.vmem %s29_s13, 256  ;;  %p427_p1 = scmp.lt.s32.totalorder %s29_s13, %s29_s13 }
   0x5   :  { %p423_p0 = scmp.ne.s32.totalorder %s29_s13, %s422_s14  ;;  %p428_p2 = scmp.lt.s32.totalorder %s422_s14, %s422_s14 }
   0x7   :  { %p429_p3 = por %p428_p2, %p427_p1 }
   0x9   :  { %p430_p4 = pnand %p429_p3, %p423_p0 }
   0xb   :  { %433 = shalt.err (!%p430_p4)
}
   0xc   :  { %s501_s15 = smov 128   ;;  %s502_s16 = smov 8  }
   0xd   :  { %34 = dma.hbm_to_vmem [thread:$0]  %s548_s1, 256, %s29_s13, [#allocation7], %s501_s15, %s501_s15, %s502_s16  }
   0xe   :  { %s503_s19 = smov [#allocation3]  }
   0xf   :  { %s16_s20 = sshll.u32 %s503_s19, 4  ;;  %s17_s20 = int_to_ptr.vmem [resolvable:$true] %s16_s20 }
  0x10   :  { %s442_s21 = scalar_lea.vmem %s17_s20, 128  ;;  %p447_p6 = scmp.lt.s32.totalorder %s17_s20, %s17_s20 }
  0x11   :  { %p443_p5 = scmp.ne.s32.totalorder %s17_s20, %s442_s21  ;;  %p448_p7 = scmp.lt.s32.totalorder %s442_s21, %s442_s21 }
  0x13   :  { %p449_p8 = por %p448_p7, %p447_p6 }
  0x15   :  { %p450_p9 = pnand %p449_p8, %p443_p5 }
  0x17   :  { %453 = shalt.err (!%p450_p9)
}
  0x18   :  { %s504_s22 = smov 64   ;;  %s505_s23 = smov 4  }
  0x19   :  { %22 = dma.hbm_to_vmem [thread:$0]  %s547_s0, 128, %s17_s20, [#allocation4], %s504_s22, %s504_s22, %s505_s23  }
  0x1a   :  { %s506_s26 = smov [#allocation8]  }
  0x1b   :  { %s40_s27 = sshll.u32 %s506_s26, 4  ;;  %s41_s27 = int_to_ptr.vmem [resolvable:$true] %s40_s27 }
  0x1c   :  { %s462_s1 = scalar_lea.vmem %s41_s27, 2048  ;;  %p467_p11 = scmp.lt.s32.totalorder %s41_s27, %s41_s27 }
  0x1d   :  { %p463_p10 = scmp.ne.s32.totalorder %s41_s27, %s462_s1  ;;  %p468_p12 = scmp.lt.s32.totalorder %s462_s1, %s462_s1 }
  0x1f   :  { %p469_p13 = por %p468_p12, %p467_p11 }
  0x21   :  { %p470_p0 = pnand %p469_p13, %p463_p10 }
  0x23   :  { %473 = shalt.err (!%p470_p0)
}
  0x24   :  { %46 = dma.hbm_to_vmem [thread:$0]  %s549_s2, 2048, %s41_s27, [#allocation7], %s504_s22, %s504_s22, %s505_s23  }
  0x25   :  { %494 = dma.done.wait [#allocation4], 128  }
  0x26   :  { %495 = vsyncadd [#allocation4], 4294967168 }
  0x27   :  { %496 = dma.done.wait [#allocation7], 2304  }
  0x28   :  { %497 = vsyncadd [#allocation7], 4294964992  ;;  %v507_v0 = vmov 0   ;;  %v386_v1 = vld [vmem:[#allocation6 + $0x4] ss:$8 sps:$4 sm:$0xff]   ;;  %v389_v3 = vld [vmem:[#allocation3] sm:$0xff]  }
  0x29   :  { %118 = vmatprep.mubr.bf16.mxu0 %v507_v0  ;;  %v388_v2 = vld [vmem:[#allocation6] ss:$8 sps:$4 sm:$0xff]   ;;  %100 = vmatprep.subr.bf16.mxu0 %v386_v1  ;;  %vm82_vm0 = vcmask 130048   ;;  %v394_v8 = vld [vmem:[#allocation8 + $0x68] sm:$0xff]   ;;  %v396_v10 = vld [vmem:[#allocation8 + $0x60] sm:$0xff]   ;;  %s508_s0 = smov [#allocation9]  }
  0x2a   :  { %101 = vmatpush1.bf16.msra.mxu0 %v388_v2  ;;  %v390_v4 = vld [vmem:[#allocation8 + $0x78] sm:$0xff]   ;;  %v392_v6 = vld [vmem:[#allocation8 + $0x70] sm:$0xff]   ;;  %v395_v9 = vld [vmem:[#allocation8 + $0x28] sm:$0xff]   ;;  %s322_s2 = sshll.u32 %s508_s0, 4  ;;  %s323_s2 = int_to_ptr.vmem [resolvable:$true] %s322_s2 }
  0x2b   :  { %v391_v5 = vld [vmem:[#allocation8 + $0x38] sm:$0xff]   ;;  %355 = vmatprep.subr.bf16.mxu1 %v390_v4  ;;  %v393_v7 = vld [vmem:[#allocation8 + $0x30] sm:$0xff]   ;;  %v397_v11 = vld [vmem:[#allocation8 + $0x20] sm:$0xff]   ;;  %s474_s30 = scalar_lea.vmem %s323_s2, 256  ;;  %p479_p2 = scmp.lt.s32.totalorder %s323_s2, %s323_s2 }
  0x2c   :  { %356 = vmatpush3.bf16.msra.mxu1 %v391_v5  ;;  %v398_v12 = vld [vmem:[#allocation8 + $0x58] sm:$0xff]   ;;  %v400_v14 = vld [vmem:[#allocation8 + $0x50] sm:$0xff]   ;;  %v402_v16 = vld [vmem:[#allocation8 + $0x48] sm:$0xff]   ;;  %p475_p1 = scmp.ne.s32.totalorder %s323_s2, %s474_s30  ;;  %p480_p3 = scmp.lt.s32.totalorder %s474_s30, %s474_s30 }
  0x2d   :  { %338 = vmatmul.mubr.msk.bf16.vlgmr.msra.gmra.mxu0 %vm82_vm0, %v389_v3  ;;  %357 = vmatprep.subr.bf16.mxu1 %v392_v6  ;;  %v399_v13 = vld [vmem:[#allocation8 + $0x18] sm:$0xff]   ;;  %v401_v15 = vld [vmem:[#allocation8 + $0x10] sm:$0xff]   ;;  %v403_v17 = vld [vmem:[#allocation8 + $0x8] sm:$0xff]  }
  0x2e   :  { %v404_v18 = vld [vmem:[#allocation8 + $0x40] sm:$0xff]   ;;  %p481_p4 = por %p480_p3, %p479_p2 }
  0x2f   :  { %v405_v19 = vld [vmem:[#allocation8] sm:$0xff]  }
  0x30   :  { %358 = vmatpush3.bf16.msra.mxu1 %v393_v7  ;;  %p482_p5 = pnand %p481_p4, %p475_p1 }
  0x31   :  { %359 = vmatprep.subr.bf16.mxu1 %v394_v8 }
  0x34   :  { %360 = vmatpush3.bf16.msra.mxu1 %v395_v9 }
  0x35   :  { %361 = vmatprep.subr.bf16.mxu1 %v396_v10 }
  0x38   :  { %362 = vmatpush3.bf16.msra.mxu1 %v397_v11 }
  0x39   :  { %363 = vmatprep.subr.bf16.mxu1 %v398_v12 }
  0x3c   :  { %364 = vmatpush3.bf16.msra.mxu1 %v399_v13 }
  0x3d   :  { %365 = vmatprep.subr.bf16.mxu1 %v400_v14 }
  0x40   :  { %366 = vmatpush3.bf16.msra.mxu1 %v401_v15 }
  0x41   :  { %367 = vmatprep.subr.bf16.mxu1 %v402_v16 }
  0x44   :  { %368 = vmatpush3.bf16.msra.mxu1 %v403_v17 }
  0x45   :  { %369 = vmatprep.subr.bf16.mxu1 %v404_v18 }
  0x48   :  { %370 = vmatpush3.bf16.msra.mxu1 %v405_v19 }
  0xed   :  { %v120_v20 = vpop.f32.mrf.mxu0 }
  0xef   :  { %v122_v21 = vpop.f32.mrf.mxu0 }
  0xf0   :  { %406 = vtanh.f32 %v122_v21 }
  0xf1   :  { %v124_v22 = vpop.f32.mrf.mxu0 }
  0xf2   :  { %408 = vtanh.f32 %v124_v22 }
  0xf3   :  { %v126_v23 = vpop.f32.mrf.mxu0 }
  0xf4   :  { %410 = vtanh.f32 %v126_v23 }
  0xf5   :  { %412 = vtanh.f32 %v120_v20 }
  0xfd   :  { %v407_v24 = vpop.eup %406 }
  0xff   :  { %v409_v25 = vpop.eup %408 }
 0x101   :  { %v411_v26 = vpop.eup %410 }
 0x102   :  { %v413_v27 = vpop.eup %412  ;;  %v136_v28 = vpack.c.bf16 %v411_v26, %v407_v24 }
 0x103   :  { %v135_v29 = vpack.c.bf16 %v409_v25, %v413_v27 }
 0x104   :  { %297 = vmatprep.mubr.bf16.mxu1 %v136_v28 }
 0x105   :  { %298 = vmatmul.mubr.bf16.vlgmr.msra.gmra.mxu1 %v135_v29 }
 0x1c5   :  { %v371_v30 = vpop.f32.mrf.mxu1 }
 0x1c7   :  { %v372_v31 = vpop.f32.mrf.mxu1 }
 0x1c8   :  { %v373_v32 = vadd.f32 %v372_v31, %v371_v30 }
 0x1c9   :  { %v374_v33 = vpop.f32.mrf.mxu1 }
 0x1ca   :  { %315 = vst [vmem:[#allocation9] sm:$0xff] %v373_v32 }
 0x1cb   :  { %v375_v34 = vpop.f32.mrf.mxu1 }
 0x1cc   :  { %v376_v35 = vadd.f32 %v375_v34, %v374_v33 }
 0x1ce   :  { %316 = vst [vmem:[#allocation9 + $0x8] sm:$0xff] %v376_v35 }
 0x1cf   :  { %485 = shalt.err (!%p482_p5)
}
 0x1d0   :  { %328 = dma.vmem_to_hbm [thread:$0]  %s323_s2, 256, %s550_s3, [#allocation5], %s501_s15, %s501_s15, %s502_s16  }
 0x1d1   :  { %498 = dma.done.wait [#allocation5], 256  }
 0x1d2   :  { %499 = vsyncadd [#allocation5], 4294967040 }
 0x1d3   :  { %332 = vsyncpa [#allocation4], 1 }
 0x1d4   :  { %333 = vsyncpa [#allocation7], 1 }
 0x1d5   :  { %334 = vsyncpa [#allocation5], 1 }

</bundles_post_ra>
